<compile_context>
chip_gen: v7x
topology: tpu7x:2x2x1
jax: 0.10.0
libtpu: 0.0.40
codegen_flags: <defaults>
</compile_context>

<pallas_src>
import functools
import math

import jax
import jax.numpy as jnp
import numpy as np
from jax.experimental import pallas as pl
from jax.experimental.pallas import tpu as pltpu  # noqa: F401  (TPU backend)

EMBED_DIM = 16
HEAD_DIM = 16


def mha_kernel(q_ref, k_ref, v_ref, wqk_ref, bqk_ref, wo_ref, bo_ref,
               hmask_ref, keep_ref, o_ref, *, n_head, is_casual, B, T, C, H):
    BT = B * T
    HT = n_head * T

    # ---- fused Q/K/V projection: one sublane stack + one MXU matmul --------
    # 1/sqrt(hs) is already folded into the Wq / bq columns of wqk / bqk.
    x = jnp.concatenate([q_ref[...], k_ref[...], v_ref[...]], axis=0)   # (3BT, C)
    proj = jnp.dot(x, wqk_ref[...],
                   preferred_element_type=jnp.float32) + bqk_ref[...]   # (3BT, 2H)
    qp = proj[0 * BT:1 * BT, 0:H]          # query rows x (pre-scaled) Wq cols
    kp = proj[1 * BT:2 * BT, H:2 * H]      # key   rows x Wk cols
    vp = proj[2 * BT:3 * BT, H:2 * H]      # value rows x Wk cols (PyTorch quirk)

    hmask = hmask_ref[...]                 # (HT, C): row h*T+t keeps head-h channels

    outs = []
    for b in range(B):     # static loop: the whole batch stays in ONE kernel call
        q_b = qp[b * T:(b + 1) * T, :]     # (T, C)
        k_b = kp[b * T:(b + 1) * T, :]
        v_b = vp[b * T:(b + 1) * T, :]

        # Lane-major scores: row-block h of K_heads holds only head-h channels
        # of k_b, so ONE matmul yields all heads' scores as (T, n_head*T).
        k_heads = jnp.concatenate([k_b] * n_head, axis=0) * hmask       # (HT, C)
        s = jax.lax.dot_general(q_b, k_heads, (((1,), (1,)), ((), ())),
                                preferred_element_type=jnp.float32)     # (T, HT)

        if is_casual:
            # -inf (not a large finite value) so the head-axis softmax yields
            # exactly the NaNs the PyTorch module yields.
            s = jnp.where(keep_ref[...] != 0, s, -jnp.inf)

        # Softmax over the HEAD axis (PyTorch F.softmax(..., dim=1)): the heads
        # are the n_head lane blocks of `s`.  The row max is constant along the
        # head axis, so subtracting it is mathematically identical to the
        # per-(i,j) head max and broadcasts natively from (T, 1).
        m_row = jnp.max(s, axis=-1, keepdims=True)                      # (T, 1)
        e = jnp.exp(s - m_row)                                          # one wide exp
        e_blk = [e[:, h * T:(h + 1) * T] for h in range(n_head)]        # lane blocks
        den = functools.reduce(jnp.add, e_blk)                          # (T, T)
        inv = pl.reciprocal(den, approx=False)                          # one reciprocal
        # Aligned sublane stack of the normalized head blocks (no unaligned
        # minor-dim concat / roll needed).
        p = jnp.concatenate([blk * inv for blk in e_blk], axis=0)       # (HT, T)

        # attention @ V for all heads in one matmul; the head concat is the
        # hmask-select + sublane-block sum.
        av = jnp.dot(p, v_b, preferred_element_type=jnp.float32) * hmask  # (HT, C)
        outs.append(functools.reduce(
            jnp.add, [av[h * T:(h + 1) * T, :] for h in range(n_head)]))  # (T, C)

    attn = jnp.concatenate(outs, axis=0)                                # (BT, C)
    # Output Linear (concat_layer): one matmul + bias.
    o_ref[...] = jnp.dot(attn, wo_ref[...],
                         preferred_element_type=jnp.float32) + bo_ref[...]


def prepare_params(params, *, n_head, seq_len):
    """One-time (outside-jit) parameter fusion.

    Returns (wqk, bqk, wo, bo, hmask, keep):
      * wqk = [Wq / sqrt(hs) | Wk]  (C, 2H), bqk likewise (1, 2H)
      * hmask (n_head*T, C): row h*T+t keeps exactly the channels of head h
      * keep  (T, n_head*T): head-tiled causal tril keep mask (int32)
    """
    wq, bq, wk, bk, wo, bo = params
    C, H = wq.shape
    hs = C // n_head
    scale = 1.0 / math.sqrt(hs)
    wqk = jnp.concatenate([wq * scale, wk], axis=1)
    bqk = jnp.concatenate([bq * scale, bk], axis=1)

    rows = np.arange(n_head * seq_len)
    cols = np.arange(C)
    hmask = jnp.asarray(((cols[None, :] // hs) == (rows[:, None] // seq_len))
                        .astype(np.float32))

    qi = np.arange(seq_len)[:, None]
    kj = np.tile(np.arange(seq_len), n_head)[None, :]
    keep = jnp.asarray((qi >= kj).astype(np.int32))
    return (wqk, bqk, wo, bo, hmask, keep)


@functools.partial(jax.jit, static_argnames=("n_head", "is_casual"))
def multihead_attention(q, k, v, fused_params, *, n_head, is_casual):
    B, T, C = q.shape
    wqk, bqk, wo, bo, hmask, keep = fused_params
    H = wo.shape[0]
    assert H == C, "the module's head reshape requires head_dim == embed_dim"

    kernel = functools.partial(mha_kernel, n_head=n_head, is_casual=is_casual,
                               B=B, T=T, C=C, H=H)
    out = pl.pallas_call(
        kernel,
        out_shape=jax.ShapeDtypeStruct((B * T, H), jnp.float32),
    )(q.reshape(B * T, C), k.reshape(B * T, C), v.reshape(B * T, C),
      wqk, bqk, wo, bo, hmask, keep)
    return out.reshape(B, T, H)


def reference(q, k, v, params, *, n_head, is_casual):
    """Pure-JAX mirror of the PyTorch forward (for verification)."""
    wq, bq, wk, bk, wo, bo = params
    B, T, C = q.shape
    hs = C // n_head
    qp = q @ wq + bq
    kp = k @ wk + bk
    vp = v @ wk + bk                     # key layer used for V (as in PyTorch code)
    qh = qp.reshape(B, T, n_head, hs).transpose(0, 2, 1, 3)
    kh = kp.reshape(B, T, n_head, hs).transpose(0, 2, 1, 3)
    vh = vp.reshape(B, T, n_head, hs).transpose(0, 2, 1, 3)
    s = jnp.einsum('bhqd,bhkd->bhqk', qh, kh) / math.sqrt(hs)
    if is_casual:
        mask = jnp.tril(jnp.ones((T, T), bool))
        s = jnp.where(mask, s, -jnp.inf)
    m = s.max(axis=1, keepdims=True)     # softmax over dim=1 (heads)
    e = jnp.exp(s - m)
    p = e / e.sum(axis=1, keepdims=True)
    attn = jnp.einsum('bhqk,bhkd->bhqd', p, vh)
    attn = attn.transpose(0, 2, 1, 3).reshape(B, T, C)
    return attn @ wo + bo


if __name__ == "__main__":
    B, T, C, H = 2, 8, EMBED_DIM, HEAD_DIM
    n_head = 4

    key = jax.random.PRNGKey(0)
    ks = jax.random.split(key, 12)
    q = jax.random.normal(ks[0], (B, T, C), jnp.float32)
    k = jax.random.normal(ks[1], (B, T, C), jnp.float32)
    v = jax.random.normal(ks[2], (B, T, C), jnp.float32)

    # Deterministic synthetic parameters (W stored as (in, out) = PyTorch W.T).
    wq = 0.1 * jax.random.normal(ks[3], (C, H), jnp.float32)
    bq = 0.1 * jax.random.normal(ks[4], (1, H), jnp.float32)
    wk = 0.1 * jax.random.normal(ks[5], (C, H), jnp.float32)
    bk = 0.1 * jax.random.normal(ks[6], (1, H), jnp.float32)
    wv = 0.1 * jax.random.normal(ks[7], (C, H), jnp.float32)   # created but unused (as in PyTorch forward)
    bv = 0.1 * jax.random.normal(ks[8], (1, H), jnp.float32)   # created but unused
    wo = 0.1 * jax.random.normal(ks[9], (H, H), jnp.float32)
    bo = 0.1 * jax.random.normal(ks[10], (1, H), jnp.float32)
    params = (wq, bq, wk, bk, wo, bo)

    # One-time parameter fusion (outside the jitted per-call path).
    fused = prepare_params(params, n_head=n_head, seq_len=T)

    # Non-causal path: verify against the pure-JAX reference.
    out = multihead_attention(q, k, v, fused, n_head=n_head, is_casual=False)
    out = jax.block_until_ready(out)
    ref = reference(q, k, v, params, n_head=n_head, is_casual=False)
    assert out.shape == (B, T, H)
    assert np.allclose(np.asarray(out), np.asarray(ref), atol=1e-4, rtol=1e-4), \
        "kernel does not match reference (non-causal)"

    # Causal path: like the PyTorch original, the head-axis softmax of fully
    # masked positions yields NaN; only the last (fully visible) row is finite.
    out_c = multihead_attention(q, k, v, fused, n_head=n_head, is_casual=True)
    out_c = jax.block_until_ready(out_c)
    ref_c = reference(q, k, v, params, n_head=n_head, is_casual=True)
    assert np.array_equal(np.isnan(np.asarray(out_c)), np.isnan(np.asarray(ref_c))), \
        "causal NaN pattern does not match the PyTorch-quirk reference"
    assert np.allclose(np.asarray(out_c)[:, -1, :], np.asarray(ref_c)[:, -1, :],
                       atol=1e-4, rtol=1e-4), \
        "kernel does not match reference on the unmasked causal row"

    print("KERNEL_OK")
</pallas_src>

<mosaic_0001>
module attributes {stable_mosaic.version = 11 : i64} {
  func.func @mha_kernel(%arg0: memref<16x16xf32, #tpu.memory_space<vmem>>, %arg1: memref<16x16xf32, #tpu.memory_space<vmem>>, %arg2: memref<16x16xf32, #tpu.memory_space<vmem>>, %arg3: memref<16x32xf32, #tpu.memory_space<vmem>>, %arg4: memref<1x32xf32, #tpu.memory_space<vmem>>, %arg5: memref<16x16xf32, #tpu.memory_space<vmem>>, %arg6: memref<1x16xf32, #tpu.memory_space<vmem>>, %arg7: memref<32x16xf32, #tpu.memory_space<vmem>>, %arg8: memref<8x32xi32, #tpu.memory_space<vmem>>, %arg9: memref<16x16xf32, #tpu.memory_space<vmem>>) attributes {dimension_semantics = [], scalar_prefetch = 0 : i64, scratch_operands = 0 : i64, tpu.core_type = #tpu.core_type<tc>} {
    %c0 = arith.constant 0 : index
    %c0_0 = arith.constant 0 : index
    %0 = vector.load %arg0[%c0, %c0_0] : memref<16x16xf32, #tpu.memory_space<vmem>>, vector<16x16xf32>
    %c0_1 = arith.constant 0 : index
    %c0_2 = arith.constant 0 : index
    %1 = vector.load %arg1[%c0_1, %c0_2] : memref<16x16xf32, #tpu.memory_space<vmem>>, vector<16x16xf32>
    %c0_3 = arith.constant 0 : index
    %c0_4 = arith.constant 0 : index
    %2 = vector.load %arg2[%c0_3, %c0_4] : memref<16x16xf32, #tpu.memory_space<vmem>>, vector<16x16xf32>
    %3 = tpu.concatenate %0, %1, %2 in 0 : vector<16x16xf32>, vector<16x16xf32>, vector<16x16xf32> -> vector<48x16xf32>
    %c0_5 = arith.constant 0 : index
    %c0_6 = arith.constant 0 : index
    %4 = vector.load %arg3[%c0_5, %c0_6] : memref<16x32xf32, #tpu.memory_space<vmem>>, vector<16x32xf32>
    %cst = arith.constant dense<0.000000e+00> : vector<48x32xf32>
    %5 = tpu.matmul %3, %4, %cst {dimension_numbers = #tpu.dot_dimension_numbers<[1], [0], [0], [1], [0, 0, 1, 1], [], []>} : vector<48x16xf32>, vector<16x32xf32>, vector<48x32xf32> -> vector<48x32xf32>
    %c0_7 = arith.constant 0 : index
    %c0_8 = arith.constant 0 : index
    %6 = vector.load %arg4[%c0_7, %c0_8] : memref<1x32xf32, #tpu.memory_space<vmem>>, vector<1x32xf32>
    %7 = vector.broadcast %6 : vector<1x32xf32> to vector<48x32xf32>
    %8 = arith.addf %5, %7 : vector<48x32xf32>
    %9 = vector.extract_strided_slice %8 {offsets = [0, 0], sizes = [16, 16], strides = [1, 1]} : vector<48x32xf32> to vector<16x16xf32>
    %10 = vector.extract_strided_slice %8 {offsets = [16, 16], sizes = [16, 16], strides = [1, 1]} : vector<48x32xf32> to vector<16x16xf32>
    %11 = vector.extract_strided_slice %8 {offsets = [32, 16], sizes = [16, 16], strides = [1, 1]} : vector<48x32xf32> to vector<16x16xf32>
    %c0_9 = arith.constant 0 : index
    %c0_10 = arith.constant 0 : index
    %12 = vector.load %arg7[%c0_9, %c0_10] : memref<32x16xf32, #tpu.memory_space<vmem>>, vector<32x16xf32>
    %13 = vector.extract_strided_slice %9 {offsets = [0, 0], sizes = [8, 16], strides = [1, 1]} : vector<16x16xf32> to vector<8x16xf32>
    %14 = vector.extract_strided_slice %10 {offsets = [0, 0], sizes = [8, 16], strides = [1, 1]} : vector<16x16xf32> to vector<8x16xf32>
    %15 = vector.extract_strided_slice %11 {offsets = [0, 0], sizes = [8, 16], strides = [1, 1]} : vector<16x16xf32> to vector<8x16xf32>
    %16 = tpu.concatenate %14, %14, %14, %14 in 0 : vector<8x16xf32>, vector<8x16xf32>, vector<8x16xf32>, vector<8x16xf32> -> vector<32x16xf32>
    %17 = arith.mulf %16, %12 : vector<32x16xf32>
    %cst_11 = arith.constant dense<0.000000e+00> : vector<8x32xf32>
    %18 = tpu.matmul %13, %17, %cst_11 {dimension_numbers = #tpu.dot_dimension_numbers<[1], [1], [0], [0], [0, 0, 1, 0], [], []>} : vector<8x16xf32>, vector<32x16xf32>, vector<8x32xf32> -> vector<8x32xf32>
    %cst_12 = arith.constant dense<0xFF800000> : vector<8xf32>
    %19 = vector.multi_reduction <maximumf>, %18, %cst_12 [1] : vector<8x32xf32> to vector<8xf32>
    %20 = vector.shape_cast %19 : vector<8xf32> to vector<8x1xf32>
    %21 = vector.broadcast %20 : vector<8x1xf32> to vector<8x32xf32>
    %22 = arith.subf %18, %21 : vector<8x32xf32>
    %23 = math.exp %22 : vector<8x32xf32>
    %24 = vector.extract_strided_slice %23 {offsets = [0, 0], sizes = [8, 8], strides = [1, 1]} : vector<8x32xf32> to vector<8x8xf32>
    %25 = vector.extract_strided_slice %23 {offsets = [0, 8], sizes = [8, 8], strides = [1, 1]} : vector<8x32xf32> to vector<8x8xf32>
    %26 = vector.extract_strided_slice %23 {offsets = [0, 16], sizes = [8, 8], strides = [1, 1]} : vector<8x32xf32> to vector<8x8xf32>
    %27 = vector.extract_strided_slice %23 {offsets = [0, 24], sizes = [8, 8], strides = [1, 1]} : vector<8x32xf32> to vector<8x8xf32>
    %28 = arith.addf %24, %25 : vector<8x8xf32>
    %29 = arith.addf %28, %26 : vector<8x8xf32>
    %30 = arith.addf %29, %27 : vector<8x8xf32>
    %31 = tpu.reciprocal %30 : vector<8x8xf32> -> vector<8x8xf32>
    %32 = arith.mulf %24, %31 : vector<8x8xf32>
    %33 = arith.mulf %25, %31 : vector<8x8xf32>
    %34 = arith.mulf %26, %31 : vector<8x8xf32>
    %35 = arith.mulf %27, %31 : vector<8x8xf32>
    %36 = tpu.concatenate %32, %33, %34, %35 in 0 : vector<8x8xf32>, vector<8x8xf32>, vector<8x8xf32>, vector<8x8xf32> -> vector<32x8xf32>
    %cst_13 = arith.constant dense<0.000000e+00> : vector<32x16xf32>
    %37 = tpu.matmul %36, %15, %cst_13 {dimension_numbers = #tpu.dot_dimension_numbers<[1], [0], [0], [1], [0, 0, 1, 1], [], []>} : vector<32x8xf32>, vector<8x16xf32>, vector<32x16xf32> -> vector<32x16xf32>
    %38 = arith.mulf %37, %12 : vector<32x16xf32>
    %39 = vector.extract_strided_slice %38 {offsets = [0, 0], sizes = [8, 16], strides = [1, 1]} : vector<32x16xf32> to vector<8x16xf32>
    %40 = vector.extract_strided_slice %38 {offsets = [8, 0], sizes = [8, 16], strides = [1, 1]} : vector<32x16xf32> to vector<8x16xf32>
    %41 = vector.extract_strided_slice %38 {offsets = [16, 0], sizes = [8, 16], strides = [1, 1]} : vector<32x16xf32> to vector<8x16xf32>
    %42 = vector.extract_strided_slice %38 {offsets = [24, 0], sizes = [8, 16], strides = [1, 1]} : vector<32x16xf32> to vector<8x16xf32>
    %43 = arith.addf %39, %40 : vector<8x16xf32>
    %44 = arith.addf %43, %41 : vector<8x16xf32>
    %45 = arith.addf %44, %42 : vector<8x16xf32>
    %46 = vector.extract_strided_slice %9 {offsets = [8, 0], sizes = [8, 16], strides = [1, 1]} : vector<16x16xf32> to vector<8x16xf32>
    %47 = vector.extract_strided_slice %10 {offsets = [8, 0], sizes = [8, 16], strides = [1, 1]} : vector<16x16xf32> to vector<8x16xf32>
    %48 = vector.extract_strided_slice %11 {offsets = [8, 0], sizes = [8, 16], strides = [1, 1]} : vector<16x16xf32> to vector<8x16xf32>
    %49 = tpu.concatenate %47, %47, %47, %47 in 0 : vector<8x16xf32>, vector<8x16xf32>, vector<8x16xf32>, vector<8x16xf32> -> vector<32x16xf32>
    %50 = arith.mulf %49, %12 : vector<32x16xf32>
    %cst_14 = arith.constant dense<0.000000e+00> : vector<8x32xf32>
    %51 = tpu.matmul %46, %50, %cst_14 {dimension_numbers = #tpu.dot_dimension_numbers<[1], [1], [0], [0], [0, 0, 1, 0], [], []>} : vector<8x16xf32>, vector<32x16xf32>, vector<8x32xf32> -> vector<8x32xf32>
    %cst_15 = arith.constant dense<0xFF800000> : vector<8xf32>
    %52 = vector.multi_reduction <maximumf>, %51, %cst_15 [1] : vector<8x32xf32> to vector<8xf32>
    %53 = vector.shape_cast %52 : vector<8xf32> to vector<8x1xf32>
    %54 = vector.broadcast %53 : vector<8x1xf32> to vector<8x32xf32>
    %55 = arith.subf %51, %54 : vector<8x32xf32>
    %56 = math.exp %55 : vector<8x32xf32>
    %57 = vector.extract_strided_slice %56 {offsets = [0, 0], sizes = [8, 8], strides = [1, 1]} : vector<8x32xf32> to vector<8x8xf32>
    %58 = vector.extract_strided_slice %56 {offsets = [0, 8], sizes = [8, 8], strides = [1, 1]} : vector<8x32xf32> to vector<8x8xf32>
    %59 = vector.extract_strided_slice %56 {offsets = [0, 16], sizes = [8, 8], strides = [1, 1]} : vector<8x32xf32> to vector<8x8xf32>
    %60 = vector.extract_strided_slice %56 {offsets = [0, 24], sizes = [8, 8], strides = [1, 1]} : vector<8x32xf32> to vector<8x8xf32>
    %61 = arith.addf %57, %58 : vector<8x8xf32>
    %62 = arith.addf %61, %59 : vector<8x8xf32>
    %63 = arith.addf %62, %60 : vector<8x8xf32>
    %64 = tpu.reciprocal %63 : vector<8x8xf32> -> vector<8x8xf32>
    %65 = arith.mulf %57, %64 : vector<8x8xf32>
    %66 = arith.mulf %58, %64 : vector<8x8xf32>
    %67 = arith.mulf %59, %64 : vector<8x8xf32>
    %68 = arith.mulf %60, %64 : vector<8x8xf32>
    %69 = tpu.concatenate %65, %66, %67, %68 in 0 : vector<8x8xf32>, vector<8x8xf32>, vector<8x8xf32>, vector<8x8xf32> -> vector<32x8xf32>
    %cst_16 = arith.constant dense<0.000000e+00> : vector<32x16xf32>
    %70 = tpu.matmul %69, %48, %cst_16 {dimension_numbers = #tpu.dot_dimension_numbers<[1], [0], [0], [1], [0, 0, 1, 1], [], []>} : vector<32x8xf32>, vector<8x16xf32>, vector<32x16xf32> -> vector<32x16xf32>
    %71 = arith.mulf %70, %12 : vector<32x16xf32>
    %72 = vector.extract_strided_slice %71 {offsets = [0, 0], sizes = [8, 16], strides = [1, 1]} : vector<32x16xf32> to vector<8x16xf32>
    %73 = vector.extract_strided_slice %71 {offsets = [8, 0], sizes = [8, 16], strides = [1, 1]} : vector<32x16xf32> to vector<8x16xf32>
    %74 = vector.extract_strided_slice %71 {offsets = [16, 0], sizes = [8, 16], strides = [1, 1]} : vector<32x16xf32> to vector<8x16xf32>
    %75 = vector.extract_strided_slice %71 {offsets = [24, 0], sizes = [8, 16], strides = [1, 1]} : vector<32x16xf32> to vector<8x16xf32>
    %76 = arith.addf %72, %73 : vector<8x16xf32>
    %77 = arith.addf %76, %74 : vector<8x16xf32>
    %78 = arith.addf %77, %75 : vector<8x16xf32>
    %79 = tpu.concatenate %45, %78 in 0 : vector<8x16xf32>, vector<8x16xf32> -> vector<16x16xf32>
    %c0_17 = arith.constant 0 : index
    %c0_18 = arith.constant 0 : index
    %80 = vector.load %arg5[%c0_17, %c0_18] : memref<16x16xf32, #tpu.memory_space<vmem>>, vector<16x16xf32>
    %cst_19 = arith.constant dense<0.000000e+00> : vector<16x16xf32>
    %81 = tpu.matmul %79, %80, %cst_19 {dimension_numbers = #tpu.dot_dimension_numbers<[1], [0], [0], [1], [0, 0, 1, 1], [], []>} : vector<16x16xf32>, vector<16x16xf32>, vector<16x16xf32> -> vector<16x16xf32>
    %c0_20 = arith.constant 0 : index
    %c0_21 = arith.constant 0 : index
    %82 = vector.load %arg6[%c0_20, %c0_21] : memref<1x16xf32, #tpu.memory_space<vmem>>, vector<1x16xf32>
    %83 = vector.broadcast %82 : vector<1x16xf32> to vector<16x16xf32>
    %84 = arith.addf %81, %83 : vector<16x16xf32>
    %c0_22 = arith.constant 0 : index
    %c0_23 = arith.constant 0 : index
    %85 = vector.load %arg9[%c0_22, %c0_23] : memref<16x16xf32, #tpu.memory_space<vmem>>, vector<16x16xf32>
    tpu.vector_store %arg9[%c0_22, %c0_23], %84 {strides = array<i32>} : memref<16x16xf32, #tpu.memory_space<vmem>>, vector<16x16xf32>,
    return
  }
}

</mosaic_0001>

<bundles_post_ra>
// kernel: multihead_attention.1
= control target key start
LH: loop header
LB: loop body
LE: loop exit
PB: predicated region body
PF: predicated region fallthrough
CT: control target
= control target key end

     0   :  { %14 = vsyncpa [#allocation3], 0  ;;  %s1336_s0 = inlined_call_operand.vmem [shape: f32[16,16], index: 0, kind: input, shape index: {}]   ;;  %s1337_s1 = inlined_call_operand.vmem [shape: f32[16,16], index: 1, kind: input, shape index: {}]   ;;  %s1338_s2 = inlined_call_operand.vmem [shape: f32[16,16], index: 2, kind: input, shape index: {}]   ;;  %s1339_s3 = inlined_call_operand.hbm [shape: f32[16,32], index: 3, kind: input, shape index: {}]   ;;  %s1340_s4 = inlined_call_operand.vmem [shape: f32[1,32], index: 4, kind: input, shape index: {}]   ;;  %s1341_s5 = inlined_call_operand.hbm [shape: f32[16,16], index: 5, kind: input, shape index: {}]   ;;  %s1342_s6 = inlined_call_operand.vmem [shape: f32[1,16], index: 6, kind: input, shape index: {}]   ;;  %s1343_s7 = inlined_call_operand.vmem [shape: f32[32,16], index: 7, kind: input, shape index: {}]   ;;  %s1344_s8 = inlined_call_operand.vmem [shape: s32[8,32], index: 8, kind: input, shape index: {}]   ;;  %s1345_s9 = inlined_call_operand.hbm [shape: f32[16,16], index: 9, kind: output, shape index: {}]  }
   0x1   :  { %15 = vsyncpa [#allocation6], 0 }
   0x2   :  { %16 = vsyncpa [#allocation4], 0  ;;  %s1067_s30 = smov [#allocation2]   ;;  %s995_s13 = scalar_lea.hbm %s1339_s3, 256 }
   0x3   :  { %s28_s10 = sshll.u32 %s1067_s30, 4  ;;  %p996_p0 = scmp.ne.s32.totalorder %s1339_s3, %s995_s13  ;;  %s29_s10 = int_to_ptr.vmem [resolvable:$true] %s28_s10 }
   0x4   :  { %p999_p1 = scmp.lt.u32.totalorder %s995_s13, %s1339_s3 }
   0x6   :  { %p1001_p2 = pnand %p999_p1, %p996_p0 }
   0x8   :  { %1004 = shalt.err (!%p1001_p2)
}
   0x9   :  { %s1005_s8 = scalar_lea.vmem %s29_s10, 256  ;;  %p1010_p4 = scmp.lt.s32.totalorder %s29_s10, %s29_s10 }
   0xa   :  { %p1006_p3 = scmp.ne.s32.totalorder %s29_s10, %s1005_s8  ;;  %p1011_p5 = scmp.lt.s32.totalorder %s1005_s8, %s1005_s8 }
   0xc   :  { %p1012_p6 = por %p1011_p5, %p1010_p4 }
   0xe   :  { %p1013_p7 = pnand %p1012_p6, %p1006_p3 }
  0x10   :  { %1016 = shalt.err (!%p1013_p7)
}
  0x11   :  { %s1068_s18 = smov 128   ;;  %s1069_s19 = smov 8  }
  0x12   :  { %34 = dma.hbm_to_vmem [thread:$0]  %s1339_s3, 256, %s29_s10, [#allocation3], %s1068_s18, %s1068_s18, %s1069_s19  }
  0x13   :  { %s1070_s22 = smov [#allocation5]   ;;  %s1017_s26 = scalar_lea.hbm %s1341_s5, 256 }
  0x14   :  { %s42_s23 = sshll.u32 %s1070_s22, 4  ;;  %p1018_p8 = scmp.ne.s32.totalorder %s1341_s5, %s1017_s26  ;;  %s43_s23 = int_to_ptr.vmem [resolvable:$true] %s42_s23 }
  0x15   :  { %p1021_p9 = scmp.lt.u32.totalorder %s1017_s26, %s1341_s5 }
  0x17   :  { %p1023_p10 = pnand %p1021_p9, %p1018_p8 }
  0x19   :  { %1026 = shalt.err (!%p1023_p10)
}
  0x1a   :  { %s1027_s11 = scalar_lea.vmem %s43_s23, 256  ;;  %p1032_p12 = scmp.lt.s32.totalorder %s43_s23, %s43_s23 }
  0x1b   :  { %p1028_p11 = scmp.ne.s32.totalorder %s43_s23, %s1027_s11  ;;  %p1033_p13 = scmp.lt.s32.totalorder %s1027_s11, %s1027_s11 }
  0x1d   :  { %p1034_p0 = por %p1033_p13, %p1032_p12 }
  0x1f   :  { %p1035_p1 = pnand %p1034_p0, %p1028_p11 }
  0x21   :  { %1038 = shalt.err (!%p1035_p1)
}
  0x22   :  { %48 = dma.hbm_to_vmem [thread:$0]  %s1341_s5, 256, %s43_s23, [#allocation6], %s1068_s18, %s1068_s18, %s1069_s19  }
  0x23   :  { %1061 = dma.done.wait [#allocation3], 256  }
  0x24   :  { %1062 = vsyncadd [#allocation3], 4294967040 }
  0x25   :  { %1063 = dma.done.wait [#allocation6], 256  }
  0x26   :  { %1064 = vsyncadd [#allocation6], 4294967040  ;;  %vm76_vm0 = vcmask 130048   ;;  %v67_v0 = vld [vmem:[#allocation2] sm:$0xff]  ;;  %v68_v1 = vld [vmem:[#allocation2 + $0x8] sm:$0xff]  ;;  %s1071_s17 = smov 16  }
  0x27   :  { %v61_v2 = vld [vmem:[%s1336_s0] sm:$0xff]  ;;  %v930_v3 = vpack.c.bf16 %v68_v1, %v67_v0  ;;  %v1167_v4 = vld [vmem:[%s1343_s7 + $0x10] sm:$0xff]  ;;  %v62_v6 = vld [vmem:[%s1336_s0 + $0x8] sm:$0xff]  ;;  %v1072_v15 = vmov 0.0|0.0   ;;  %s1073_s28 = smov 112   ;;  %vm1074_vm1 = vmmov 0  }
  0x28   :  { %876 = vmatprep.mubr.msk.f32.mxu0 %vm76_vm0, %v61_v2  ;;  %v1172_v5 = vld [vmem:[%s1343_s7] sm:$0xff]  ;;  %202 = vrot.lane.b32.xlu1 %v1167_v4, %s1071_s17  ;;  %v1184_v7 = vld [vmem:[%s1343_s7 + $0x18] sm:$0xff]  ;;  %v1192_v9 = vld [vmem:[%s1343_s7 + $0x8] sm:$0xff]  ;;  %v1075_v28 = vmov 0.0   ;;  %vm307_vm3 = vcmask 261120   ;;  %s1076_s3 = smov 120  }
  0x29   :  { %931 = vmatprep.subr.bf16.mxu0 %v930_v3  ;;  %198 = vrot.lane.b32.xlu0 %v1172_v5, %s1071_s17  ;;  %v63_v8 = vld [vmem:[%s1337_s1] sm:$0xff]  ;;  %v64_v10 = vld [vmem:[%s1337_s1 + $0x8] sm:$0xff]  ;;  %vm1233_vm2 = vmpackc.low %vm76_vm0, %vm76_vm0  ;;  %vm355_vm4 = vcmask 64512   ;;  %s1078_s10 = smov 24   ;;  %s1079_s14 = smov [#allocation7]  }
  0x2a   :  { %933 = vmatpush3.bf16.msra.mxu0 %v930_v3  ;;  %934 = vmatprep.subr.bf16.mxu1 %v1072_v15  ;;  %v1218_v18 = vld [vmem:[%s1340_s4] ss:$0 sm:$0xff]  ;;  %v66_v40 = vld [vmem:[%s1338_s2 + $0x8] sm:$0xff]  ;;  %s799_s15 = sshll.u32 %s1079_s14, 4  ;;  %s800_s15 = int_to_ptr.vmem [resolvable:$true] %s799_s15 }
  0x2b   :  { %893 = vmatprep.mubr.msk.f32.mxu1 %vm1074_vm1, %v1075_v28  ;;  %v65_v39 = vld [vmem:[%s1338_s2] sm:$0xff]  ;;  %s1077_s2 = smov 104   ;;  %s1039_s5 = scalar_lea.vmem %s800_s15, 256 }
  0x2c   :  { %204 = vrot.lane.b32.xlu1 %v1184_v7, %s1071_s17  ;;  %p1040_p2 = scmp.ne.s32.totalorder %s800_s15, %s1039_s5  ;;  %p1044_p3 = scmp.lt.s32.totalorder %s800_s15, %s800_s15 }
  0x2d   :  { %877 = vmatmul.mubr.msk.f32.vlgmr.msra.gmra.mrb[0].mxu0 %vm76_vm0, %v62_v6  ;;  %200 = vrot.lane.b32.xlu0 %v1192_v9, %s1071_s17  ;;  %p1045_p4 = scmp.lt.s32.totalorder %s1039_s5, %s1039_s5 }
  0x2e   :  { %879 = vmatprep.mubr.msk.f32.mxu0 %vm76_vm0, %v63_v8 }
  0x2f   :  { %p1046_p5 = por %p1045_p4, %p1044_p3 }
  0x31   :  { %880 = vmatmul.mubr.msk.f32.gmra.mrb[2].mxu0 %vm76_vm0, %v64_v10  ;;  %p1047_p6 = pnand %p1046_p5, %p1040_p2 }
  0x32   :  { %882 = vmatprep.mubr.msk.f32.mxu0 %vm76_vm0, %v65_v39 }
  0x35   :  { %883 = vmatmul.mubr.msk.f32.gmra.mrb[4].mxu0 %vm76_vm0, %v66_v40 }
  0x9a   :  { %v1204_v11 = vpop.permute.xlu1 %202 }
  0x9b   :  { %v1206_v12 = vpop.permute.xlu0 %198 }
  0x9e   :  { %v1213_v17 = vpop.permute.xlu1 %204 }
  0x9f   :  { %v1220_v20 = vpop.permute.xlu0 %200 }
 0x100   :  { %v1208_v13 = vpop.f32.mrb[0].mxu0 }
 0x101   :  { %v161_v14 = vpop.f32.mrb[1].mxu0 }
 0x102   :  { %v162_v38 = vadd.f32 %v1218_v18, %v161_v14 }
 0x104   :  { %v1211_v16 = vpop.f32.mrb[2].mxu0 }
 0x105   :  { %v171_v19 = vpop.f32.mrb[3].mxu0  ;;  %v177_v58 = vadd.f32 %v1211_v16, %v1218_v18 }
 0x106   :  { %v172_v21 = vadd.f32 %v1218_v18, %v171_v19 }
 0x107   :  { %v457_v60 = vmul.f32 %v1206_v12, %v177_v58  ;;  %v458_v61 = vmul.f32 %v1220_v20, %v177_v58  ;;  %v459_v62 = vmul.f32 %v1204_v11, %v177_v58  ;;  %v460_v63 = vmul.f32 %v1213_v17, %v177_v58 }
 0x108   :  { %v212_v22 = vmul.f32 %v1204_v11, %v172_v21  ;;  %v213_v23 = vmul.f32 %v1213_v17, %v172_v21  ;;  %v210_v24 = vmul.f32 %v1206_v12, %v172_v21  ;;  %v211_v25 = vmul.f32 %v1220_v20, %v172_v21  ;;  %v1256_v48 = vpop.f32.mrb[4].mxu0 }
 0x109   :  { %v181_v49 = vpop.f32.mrb[5].mxu0  ;;  %v977_v0 = vpack.i.bf16 %v458_v61, %v457_v60  ;;  %v982_v1 = vpack.i.bf16 %v460_v63, %v459_v62  ;;  %v702_v62 = vld [vmem:[#allocation5] sm:$0xff]  ;;  %v703_v63 = vld [vmem:[#allocation5 + $0x8] sm:$0xff] }
 0x10a   :  { %v972_v26 = vpack.i.bf16 %v213_v23, %v212_v22  ;;  %v967_v27 = vpack.i.bf16 %v211_v25, %v210_v24  ;;  %v182_v59 = vadd.f32 %v1218_v18, %v181_v49 }
 0x10c   :  { %973 = vrot.lane.b32.xlu1 %v972_v26, %s1073_s28  ;;  %968 = vrot.lane.b32.xlu0 %v967_v27, %s1073_s28  ;;  %v167_v27 = vadd.f32 %v1208_v13, %v1218_v18 }
 0x17e   :  { %v969_v29 = vpop.permute.xlu0 %968  ;;  %v974_v34 = vpop.permute.xlu1 %973 }
 0x17f   :  { %v971_v30 = vunpack.i.h.bf16 %v969_v29  ;;  %v970_v31 = vunpack.i.l.bf16 %v969_v29  ;;  %v976_v35 = vunpack.i.h.bf16 %v974_v34  ;;  %v975_v36 = vunpack.i.l.bf16 %v974_v34 }
 0x181   :  { %v935_v33 = vpack.c.bf16 %v971_v30, %v970_v31  ;;  %v939_v37 = vpack.c.bf16 %v976_v35, %v975_v36 }
 0x183   :  { %937 = vmatpush3.bf16.xpose.msk.msra.mxu1 %vm1233_vm2, %v935_v33 }
 0x184   :  { %938 = vmatprep.subr.bf16.mxu1 %v1072_v15 }
 0x18b   :  { %941 = vmatpush3.bf16.xpose.msk.msra.mxu1 %vm1233_vm2, %v939_v37 }
 0x192   :  { %894 = vmatmul.mubr.msk.f32.vlgmr.msra.gmra.mrb[0].mxu1 %vm76_vm0, %v162_v38 }
 0x265   :  { %v303_v41 = vpop.f32.mrb[0].mxu1 }
 0x266   :  { %v895_v42 = vpop.f32.mrb[1].mxu1  ;;  %v308_v43 = vsel %vm307_vm3, %v303_v41, -inf }
 0x267   :  { %309 = vmax.xlane.f32.xlu0 %v308_v43 }
 0x2f4   :  { %v310_v44 = vpop.xlane.xlu0 %309 }
 0x2f5   :  { %v311_v45 = vsub.f32 %v303_v41, %v310_v44 }
 0x2f7   :  { %v312_v46 = vmul.f32 1.442695, %v311_v45 }
 0x2f9   :  { %987 = vpow2.f32 %v312_v46 }
 0x303   :  { %v988_v47 = vpop.eup %987 }
 0x304   :  { %315 = vrot.lane.b32.xlu1 %v988_v47, %s1076_s3 }
 0x308   :  { %319 = vrot.lane.b32.xlu1 %v988_v47, %s1073_s28 }
 0x30c   :  { %323 = vrot.lane.b32.xlu1 %v988_v47, %s1077_s2 }
 0x376   :  { %v316_v50 = vpop.permute.xlu1 %315 }
 0x377   :  { %v318_v52 = vadd.f32 %v988_v47, %v316_v50 }
 0x37a   :  { %v320_v51 = vpop.permute.xlu1 %319 }
 0x37b   :  { %v322_v53 = vadd.f32 %v320_v51, %v318_v52 }
 0x37e   :  { %v324_v54 = vpop.permute.xlu1 %323 }
 0x37f   :  { %v326_v55 = vadd.f32 %v324_v54, %v322_v53  ;;  %v187_v53 = vadd.f32 %v1256_v48, %v1218_v18 }
 0x381   :  { %989 = vrcp.f32 %v326_v55 }
 0x38b   :  { %v990_v56 = vpop.eup %989 }
 0x38c   :  { %330 = vrot.lane.b32.xlu1 %v990_v56, %s1069_s19  ;;  %v328_v57 = vmul.f32 %v990_v56, %v988_v47 }
 0x38e   :  { %898 = vmatprep.mubr.msk.f32.mxu0 %vm355_vm4, %v328_v57 }
 0x390   :  { %334 = vrot.lane.b32.xlu1 %v990_v56, %s1071_s17 }
 0x394   :  { %338 = vrot.lane.b32.xlu1 %v990_v56, %s1078_s10 }
 0x398   :  { %352 = vrot.lane.b32.xlu1 %v182_v59, %s1073_s28 }
 0x39c   :  { %978 = vrot.lane.b32.xlu1 %v977_v0, %s1073_s28  ;;  %v950_v0 = vpack.c.bf16 %v703_v63, %v702_v62 }
 0x3a0   :  { %983 = vrot.lane.b32.xlu1 %v982_v1, %s1073_s28 }
 0x3fe   :  { %v331_v2 = vpop.permute.xlu1 %330 }
 0x3ff   :  { %v333_v3 = vmul.f32 %v988_v47, %v331_v2 }
 0x401   :  { %343 = vrot.lane.b32.xlu0 %v333_v3, %s1076_s3 }
 0x402   :  { %v335_v6 = vpop.permute.xlu1 %334 }
 0x403   :  { %v337_v8 = vmul.f32 %v988_v47, %v335_v6 }
 0x405   :  { %346 = vrot.lane.b32.xlu1 %v337_v8, %s1073_s28 }
 0x406   :  { %v339_v10 = vpop.permute.xlu1 %338 }
 0x407   :  { %v341_v12 = vmul.f32 %v988_v47, %v339_v10 }
 0x409   :  { %349 = vrot.lane.b32.xlu1 %v341_v12, %s1077_s2 }
 0x40a   :  { %v353_v11 = vpop.permute.xlu1 %352 }
 0x40b   :  { %896 = vmatprep.subr.mxu0 %v353_v11 }
 0x40c   :  { %897 = vmatpush3.msra.mxu0 %v353_v11 }
 0x40d   :  { %942 = vmatprep.subr.bf16.mxu0 %v1072_v15 }
 0x40e   :  { %v979_v14 = vpop.permute.xlu1 %978 }
 0x40f   :  { %v981_v16 = vunpack.i.h.bf16 %v979_v14  ;;  %v980_v17 = vunpack.i.l.bf16 %v979_v14 }
 0x411   :  { %v943_v19 = vpack.c.bf16 %v981_v16, %v980_v17 }
 0x412   :  { %v984_v20 = vpop.permute.xlu1 %983 }
 0x413   :  { %v986_v22 = vunpack.i.h.bf16 %v984_v20  ;;  %v985_v23 = vunpack.i.l.bf16 %v984_v20 }
 0x415   :  { %v947_v25 = vpack.c.bf16 %v986_v22, %v985_v23 }
 0x473   :  { %v344_v21 = vpop.permute.xlu0 %343 }
 0x474   :  { %899 = vmatmul.mubr.msk.f32.vlgmr.msra.gmra.mrb[6].mxu0 %vm355_vm4, %v344_v21 }
 0x475   :  { %945 = vmatpush3.bf16.xpose.msk.msra.mxu0 %vm1233_vm2, %v943_v19  ;;  %v837_v19 = vld [vmem:[%s1342_s6] ss:$0 sm:$0xff] }
 0x476   :  { %946 = vmatprep.subr.bf16.mxu0 %v1072_v15 }
 0x477   :  { %v347_v24 = vpop.permute.xlu1 %346 }
 0x478   :  { %901 = vmatprep.mubr.msk.f32.mxu0 %vm355_vm4, %v347_v24 }
 0x47b   :  { %v350_v26 = vpop.permute.xlu1 %349 }
 0x47c   :  { %902 = vmatmul.mubr.msk.f32.gmra.mrb[8].mxu0 %vm355_vm4, %v350_v26 }
 0x47d   :  { %949 = vmatpush3.bf16.xpose.msk.msra.mxu0 %vm1233_vm2, %v947_v25  ;;  %912 = vmatprep.mubr.msk.f32.mxu0 %vm1074_vm1, %v1075_v28 }
 0x484   :  { %913 = vmatmul.mubr.msk.f32.vlgmr.msra.gmra.mrb[10].mxu0 %vm76_vm0, %v167_v27 }
 0x547   :  { %v900_v15 = vpop.f32.mrb[6].mxu0 }
 0x548   :  { %v451_v29 = vmul.f32 %v900_v15, %v1192_v9  ;;  %v431_v30 = vpop.f32.mrb[7].mxu0 }
 0x549   :  { %v450_v31 = vmul.f32 %v431_v30, %v1172_v5 }
 0x54b   :  { %v454_v33 = vadd.f32 %v451_v29, %v450_v31 }
 0x54f   :  { %v903_v34 = vpop.f32.mrb[8].mxu0 }
 0x550   :  { %v441_v35 = vpop.f32.mrb[9].mxu0  ;;  %v453_v36 = vmul.f32 %v903_v34, %v1184_v7 }
 0x551   :  { %v452_v32 = vmul.f32 %v441_v35, %v1167_v4 }
 0x553   :  { %v455_v37 = vadd.f32 %v454_v33, %v452_v32 }
 0x555   :  { %v456_v28 = vadd.f32 %v455_v37, %v453_v36 }
 0x557   :  { %v550_v38 = vpop.f32.mrb[10].mxu0 }
 0x558   :  { %v914_v39 = vpop.f32.mrb[11].mxu0  ;;  %v554_v13 = vsel %vm307_vm3, %v550_v38, -inf }
 0x559   :  { %555 = vmax.xlane.f32.xlu1 %v554_v13 }
 0x5e6   :  { %v556_v40 = vpop.xlane.xlu1 %555 }
 0x5e7   :  { %v557_v41 = vsub.f32 %v550_v38, %v556_v40 }
 0x5e9   :  { %v558_v42 = vmul.f32 1.442695, %v557_v41 }
 0x5eb   :  { %991 = vpow2.f32 %v558_v42 }
 0x5f5   :  { %v992_v43 = vpop.eup %991 }
 0x5f6   :  { %561 = vrot.lane.b32.xlu0 %v992_v43, %s1076_s3 }
 0x5fa   :  { %565 = vrot.lane.b32.xlu0 %v992_v43, %s1073_s28 }
 0x5fe   :  { %569 = vrot.lane.b32.xlu0 %v992_v43, %s1077_s2 }
 0x668   :  { %v562_v44 = vpop.permute.xlu0 %561 }
 0x669   :  { %v564_v46 = vadd.f32 %v992_v43, %v562_v44 }
 0x66c   :  { %v566_v45 = vpop.permute.xlu0 %565 }
 0x66d   :  { %v568_v47 = vadd.f32 %v566_v45, %v564_v46 }
 0x670   :  { %v570_v49 = vpop.permute.xlu0 %569 }
 0x671   :  { %v572_v50 = vadd.f32 %v570_v49, %v568_v47 }
 0x673   :  { %993 = vrcp.f32 %v572_v50 }
 0x67d   :  { %v994_v51 = vpop.eup %993 }
 0x67e   :  { %576 = vrot.lane.b32.xlu0 %v994_v51, %s1069_s19  ;;  %v574_v52 = vmul.f32 %v994_v51, %v992_v43 }
 0x680   :  { %917 = vmatprep.mubr.msk.f32.mxu1 %vm355_vm4, %v574_v52 }
 0x682   :  { %580 = vrot.lane.b32.xlu0 %v994_v51, %s1071_s17 }
 0x686   :  { %584 = vrot.lane.b32.xlu0 %v994_v51, %s1078_s10 }
 0x68a   :  { %598 = vrot.lane.b32.xlu0 %v187_v53, %s1073_s28 }
 0x6f0   :  { %v577_v54 = vpop.permute.xlu0 %576 }
 0x6f1   :  { %v579_v55 = vmul.f32 %v992_v43, %v577_v54 }
 0x6f3   :  { %589 = vrot.lane.b32.xlu1 %v579_v55, %s1076_s3 }
 0x6f4   :  { %v581_v56 = vpop.permute.xlu0 %580 }
 0x6f5   :  { %v583_v57 = vmul.f32 %v992_v43, %v581_v56 }
 0x6f7   :  { %592 = vrot.lane.b32.xlu0 %v583_v57, %s1073_s28 }
 0x6f8   :  { %v585_v58 = vpop.permute.xlu0 %584 }
 0x6f9   :  { %v587_v59 = vmul.f32 %v992_v43, %v585_v58 }
 0x6fb   :  { %595 = vrot.lane.b32.xlu0 %v587_v59, %s1077_s2 }
 0x6fc   :  { %v599_v60 = vpop.permute.xlu0 %598 }
 0x6fd   :  { %915 = vmatprep.subr.mxu1 %v599_v60 }
 0x6fe   :  { %916 = vmatpush3.msra.mxu1 %v599_v60 }
 0x6ff   :  { %951 = vmatprep.subr.bf16.mxu1 %v950_v0 }
 0x765   :  { %v590_v61 = vpop.permute.xlu1 %589 }
 0x766   :  { %918 = vmatmul.mubr.msk.f32.vlgmr.msra.gmra.mrb[2].mxu1 %vm355_vm4, %v590_v61 }
 0x767   :  { %953 = vmatpush3.bf16.msra.mxu1 %v950_v0 }
 0x769   :  { %v593_v18 = vpop.permute.xlu0 %592 }
 0x76a   :  { %920 = vmatprep.mubr.msk.f32.mxu1 %vm355_vm4, %v593_v18 }
 0x76d   :  { %v596_v48 = vpop.permute.xlu0 %595 }
 0x76e   :  { %921 = vmatmul.mubr.msk.f32.gmra.mrb[4].mxu1 %vm355_vm4, %v596_v48 }
 0x76f   :  { %927 = vmatprep.mubr.msk.f32.mxu1 %vm76_vm0, %v456_v28 }
 0x839   :  { %v919_v1 = vpop.f32.mrb[2].mxu1 }
 0x83a   :  { %v696_v2 = vmul.f32 %v919_v1, %v1192_v9  ;;  %v676_v3 = vpop.f32.mrb[3].mxu1 }
 0x83b   :  { %v695_v6 = vmul.f32 %v676_v3, %v1172_v5 }
 0x83d   :  { %v699_v8 = vadd.f32 %v696_v2, %v695_v6 }
 0x841   :  { %v922_v10 = vpop.f32.mrb[4].mxu1 }
 0x842   :  { %v686_v12 = vpop.f32.mrb[5].mxu1  ;;  %v698_v14 = vmul.f32 %v922_v10, %v1184_v7 }
 0x843   :  { %v697_v11 = vmul.f32 %v686_v12, %v1167_v4 }
 0x845   :  { %v700_v16 = vadd.f32 %v699_v8, %v697_v11 }
 0x847   :  { %v701_v17 = vadd.f32 %v700_v16, %v698_v14 }
 0x849   :  { %928 = vmatmul.mubr.msk.f32.vlgmr.msra.gmra.mrb[6].mxu1 %vm76_vm0, %v701_v17 }
 0x91c   :  { %v929_v9 = vpop.f32.mrb[6].mxu1 }
 0x91d   :  { %v789_v20 = vadd.f32 %v929_v9, %v837_v19  ;;  %v783_v5 = vpop.f32.mrb[7].mxu1 }
 0x91e   :  { %v784_v21 = vadd.f32 %v837_v19, %v783_v5 }
 0x91f   :  { %793 = vst.msk [vmem:[#allocation7 + $0x8] sm:$0xff] %vm76_vm0, %v789_v20 }
 0x920   :  { %792 = vst.msk [vmem:[#allocation7] sm:$0xff] %vm76_vm0, %v784_v21 }
 0x921   :  { %1050 = shalt.err (!%p1047_p6)
}
 0x922   :  { %s1051_s17 = scalar_lea.hbm %s1345_s9, 256 }
 0x923   :  { %p1052_p7 = scmp.ne.s32.totalorder %s1345_s9, %s1051_s17  ;;  %p1055_p8 = scmp.lt.u32.totalorder %s1051_s17, %s1345_s9 }
 0x925   :  { %p1057_p9 = pnand %p1055_p8, %p1052_p7 }
 0x927   :  { %1060 = shalt.err (!%p1057_p9)
}
 0x928   :  { %805 = dma.vmem_to_hbm [thread:$0]  %s800_s15, 256, %s1345_s9, [#allocation4], %s1068_s18, %s1068_s18, %s1069_s19  }
 0x929   :  { %1065 = dma.done.wait [#allocation4], 256  }
 0x92a   :  { %1066 = vsyncadd [#allocation4], 4294967040 }
 0x92b   :  { %809 = vsyncpa [#allocation3], 1 }
 0x92c   :  { %810 = vsyncpa [#allocation6], 1 }
 0x92d   :  { %811 = vsyncpa [#allocation4], 1 }

</bundles_post_ra>
